<compile_context>
chip_gen: v7x
topology: tpu7x:2x2x1
jax: 0.10.0
libtpu: 0.0.40
codegen_flags: <defaults>
</compile_context>

<pallas_src>
import functools

import jax
import jax.numpy as jnp
from jax import lax
from jax.experimental import pallas as pl
from jax.experimental.pallas import tpu as pltpu

KERNEL_SIZE = 5
BETA = 0.01
GAMA = 0.5


# --------------------------------------------------------------------------- #
# Kernel                                                                      #
# --------------------------------------------------------------------------- #
def _ts_decom_kernel(x_ref, o_ref, *, C, F_valid, kernel_size, beta, gama):
    # x_ref: (1, Bb, Fp)    -- Bb batch rows on sublanes, flattened (t, c) on
    #                          lanes; lanes >= F_valid are padding (discarded).
    # o_ref: (3, 1, Bb, Fp) -- [x, short_term_x, long_term_x].
    pad = (kernel_size - 1) // 2
    xf = x_ref[0]                                        # (Bb, Fp), float32
    Fp = xf.shape[-1]
    lane = lax.broadcasted_iota(jnp.int32, xf.shape, 1)  # flat index j = t*C + c

    # Edge-replicated moving sum over time via lane rolls (stride = C lanes):
    #   b_s[j] = x[max(t - s, 0), c]   (head-clamped backward shift)
    #   f_s[j] = x[min(t + s, L-1), c] (tail-clamped forward shift)
    # The clamp band of shift s is exactly where the already-clamped shift s-1
    # holds the edge value, so the recursion needs no broadcast temporaries and
    # never reads padding lanes into valid lanes.
    acc = xf
    b_prev = xf
    f_prev = xf
    for s in range(1, pad + 1):
        k = s * C
        b_cur = jnp.where(lane < k, b_prev, pltpu.roll(xf, k % Fp, axis=1))
        f_cur = jnp.where(lane >= F_valid - k, f_prev,
                          pltpu.roll(xf, (Fp - k) % Fp, axis=1))
        acc = acc + b_cur + f_cur
        b_prev, f_prev = b_cur, f_cur
    moving_mean = acc * (1.0 / kernel_size)

    o_ref[0, 0] = xf
    o_ref[1, 0] = xf + beta * (moving_mean - xf)   # == (1-beta)*x + beta*mm
    o_ref[2, 0] = xf - gama * moving_mean          # == (1-gama)*x + gama*(x-mm)


# --------------------------------------------------------------------------- #
# Tiling plan (generation-aware)                                              #
# --------------------------------------------------------------------------- #
def _tpu_budget():
    """Return (input-tile byte target, vmem_limit_bytes, two_tensorcores?)."""
    vmem_cap = None
    try:
        vmem_cap = getattr(pltpu.get_tpu_info(), "vmem_capacity_bytes", None)
    except Exception:
        vmem_cap = None
    if not vmem_cap:
        vmem_cap = 64 * 1024 * 1024               # conservative (v7x-sized)
    if vmem_cap <= 64 * 1024 * 1024:              # v7x: 64 MiB VMEM/TC, 2 TCs
        target_tile = 2 * 1024 * 1024
        vmem_limit = 48 * 1024 * 1024
        two_cores = True
    else:                                         # v5e / v6e: 128 MiB VMEM, 1 TC
        target_tile = 4 * 1024 * 1024
        vmem_limit = 96 * 1024 * 1024
        two_cores = False
    vmem_limit = min(vmem_limit, (int(vmem_cap) * 3) // 4)
    return target_tile, int(vmem_limit), two_cores


def _plan_batch_block(B, row_bytes, target_tile_bytes, two_cores):
    """Pick Bb (a divisor of B) = batch rows per grid step.

    Preferences, in order: tile fits the byte budget; >= 2 grid steps when the
    chip has two TensorCores (v7x shards the parallel grid axis across them);
    sublane-aligned blocks (multiples of 8) when B >= 8; even grid; then the
    largest Bb (amortizes the ~0.35 us fixed per-step pipeline overhead).
    On single-TC chips (v5e/v6e) alignment outranks the grid>=2 preference.
    """
    max_rows = max(1, int(target_tile_bytes // row_bytes))
    best_key, best_d = None, 1
    for d in range(1, B + 1):
        if B % d or (d > max_rows and d != 1):
            continue
        g = B // d
        aligned = (d % 8 == 0) if B >= 8 else True
        multi = (g >= 2) if B > 1 else True
        even = (g % 2 == 0)
        key = (multi, aligned, even, d) if two_cores else (aligned, multi, even, d)
        if best_key is None or key > best_key:
            best_key, best_d = key, d
    return best_d


# --------------------------------------------------------------------------- #
# Wrapper                                                                     #
# --------------------------------------------------------------------------- #
def ts_decom_forward(x, y, *, kernel_size=KERNEL_SIZE, beta=BETA, gama=GAMA):
    """x: (B, L, C) float32, y: (B,) labels. Returns (res_x (3B,L,C), res_y (3B,))."""
    if kernel_size % 2 != 1:
        raise ValueError("kernel_size must be odd")
    x = jnp.asarray(x, jnp.float32)
    y = jnp.asarray(y)
    B, L, C = x.shape
    F = L * C
    Fp = -(-F // 128) * 128      # lane-pad -> unmasked, lane-dense output stores

    target_tile, vmem_limit, two_cores = _tpu_budget()
    Bb = _plan_batch_block(B, Fp * x.dtype.itemsize, target_tile, two_cores)
    G = B // Bb

    xr = x.reshape(B, F)
    if Fp != F:
        # One extra pad pass on the input (and slice pass on the output) buys
        # unmasked stores on the 3x-sized output when F is not 128-aligned.
        xr = jnp.pad(xr, ((0, 0), (0, Fp - F)))
    xr = xr.reshape(G, Bb, Fp)   # contiguous -> free when Fp == F

    kernel = functools.partial(
        _ts_decom_kernel, C=C, F_valid=F,
        kernel_size=kernel_size, beta=beta, gama=gama)

    out = pl.pallas_call(
        kernel,
        out_shape=jax.ShapeDtypeStruct((3, G, Bb, Fp), x.dtype),
        grid_spec=pltpu.PrefetchScalarGridSpec(
            num_scalar_prefetch=0,
            grid=(G,),
            in_specs=[pl.BlockSpec((1, Bb, Fp), lambda g: (g, 0, 0))],
            out_specs=pl.BlockSpec((3, 1, Bb, Fp), lambda g: (0, g, 0, 0)),
        ),
        compiler_params=pltpu.CompilerParams(
            dimension_semantics=("parallel",),
            vmem_limit_bytes=vmem_limit,
        ),
    )(xr)

    # TODO(synk): optional bf16 I/O path (halves streamed HBM bytes) if callers
    # accept bf16 outputs; keep the moving-sum accumulation in float32.
    out = out.reshape(3 * B, Fp)
    if Fp != F:
        out = out[:, :F]
    res_x = out.reshape(3 * B, L, C)          # matches torch.cat(dim=0) order
    res_y = jnp.concatenate([y, y, y], axis=0)
    return res_x, res_y


# --------------------------------------------------------------------------- #
# Reference + self-test                                                       #
# --------------------------------------------------------------------------- #
def _reference_forward(x, y, *, kernel_size=KERNEL_SIZE, beta=BETA, gama=GAMA):
    pad = (kernel_size - 1) // 2
    front = jnp.repeat(x[:, 0:1, :], pad, axis=1)
    end = jnp.repeat(x[:, -1:, :], pad, axis=1)
    xp = jnp.concatenate([front, x, end], axis=1)
    L = x.shape[1]
    mm = sum(xp[:, s:s + L, :] for s in range(kernel_size)) / kernel_size
    short = (1.0 - beta) * x + beta * mm
    longx = (1.0 - gama) * x + gama * (x - mm)
    return jnp.concatenate([x, short, longx], axis=0), jnp.concatenate([y, y, y], axis=0)


if __name__ == "__main__":
    key = jax.random.PRNGKey(0)
    shapes = [
        (2, 16, 8),    # F = 128 (lane-aligned)
        (4, 32, 4),    # F = 128
        (8, 16, 8),    # F = 128, B multiple of 8 (sublane-aligned blocks)
        (3, 10, 6),    # F = 60  (exercises the lane-pad path)
    ]
    for (B, L, C) in shapes:
        key, kx, ky = jax.random.split(key, 3)
        x = jax.random.normal(kx, (B, L, C), dtype=jnp.float32)
        y = jax.random.randint(ky, (B,), 0, 3).astype(jnp.float32)

        res_x, res_y = ts_decom_forward(x, y)
        res_x = jax.block_until_ready(res_x)
        res_y = jax.block_until_ready(res_y)

        ref_x, ref_y = _reference_forward(x, y)
        assert res_x.shape == (3 * B, L, C)
        assert res_y.shape == (3 * B,)
        assert jnp.allclose(res_x, ref_x, atol=1e-5, rtol=1e-5), (B, L, C)
        assert jnp.allclose(res_y, ref_y), (B, L, C)

    print("KERNEL_OK")
</pallas_src>

<mosaic_0001>
module attributes {stable_mosaic.version = 11 : i64} {
  func.func @_ts_decom_kernel(%arg0: i32, %arg1: memref<1x1x128xf32, #tpu.memory_space<vmem>>, %arg2: memref<3x1x1x128xf32, #tpu.memory_space<vmem>>) attributes {dimension_semantics = [#tpu.dimension_semantics<parallel>], iteration_bounds = array<i64: 2>, scalar_prefetch = 0 : i64, scratch_operands = 0 : i64, tpu.core_type = #tpu.core_type<tc>, window_params = [{transform_indices = @transform_0, window_bounds = array<i64: 1, 1, 128>}, {transform_indices = @transform_1, window_bounds = array<i64: 3, 1, 1, 128>}]} {
    %c0 = arith.constant 0 : index
    %c0_0 = arith.constant 0 : index
    %c0_1 = arith.constant 0 : index
    %0 = vector.load %arg1[%c0, %c0_0, %c0_1] : memref<1x1x128xf32, #tpu.memory_space<vmem>>, vector<1x1x128xf32>
    %1 = vector.shape_cast %0 : vector<1x1x128xf32> to vector<1x128xf32>
    %2 = tpu.iota {dimensions = array<i32: 1>} : vector<1x128xi32>
    %c8_i32 = arith.constant 8 : i32
    %3 = vector.broadcast %c8_i32 : i32 to vector<1x128xi32>
    %4 = arith.cmpi slt, %2, %3 : vector<1x128xi32>
    %c8_i32_2 = arith.constant 8 : i32
    %5 = tpu.dynamic_rotate %1 by %c8_i32_2 dim 1 : vector<1x128xf32>, i32 -> vector<1x128xf32>
    %6 = arith.select %4, %1, %5 : vector<1x128xi1>, vector<1x128xf32>
    %c120_i32 = arith.constant 120 : i32
    %7 = vector.broadcast %c120_i32 : i32 to vector<1x128xi32>
    %8 = arith.cmpi sge, %2, %7 : vector<1x128xi32>
    %c120_i32_3 = arith.constant 120 : i32
    %9 = tpu.dynamic_rotate %1 by %c120_i32_3 dim 1 : vector<1x128xf32>, i32 -> vector<1x128xf32>
    %10 = arith.select %8, %1, %9 : vector<1x128xi1>, vector<1x128xf32>
    %11 = arith.addf %1, %6 : vector<1x128xf32>
    %12 = arith.addf %11, %10 : vector<1x128xf32>
    %c16_i32 = arith.constant 16 : i32
    %13 = vector.broadcast %c16_i32 : i32 to vector<1x128xi32>
    %14 = arith.cmpi slt, %2, %13 : vector<1x128xi32>
    %c16_i32_4 = arith.constant 16 : i32
    %15 = tpu.dynamic_rotate %1 by %c16_i32_4 dim 1 : vector<1x128xf32>, i32 -> vector<1x128xf32>
    %16 = arith.select %14, %6, %15 : vector<1x128xi1>, vector<1x128xf32>
    %c112_i32 = arith.constant 112 : i32
    %17 = vector.broadcast %c112_i32 : i32 to vector<1x128xi32>
    %18 = arith.cmpi sge, %2, %17 : vector<1x128xi32>
    %c112_i32_5 = arith.constant 112 : i32
    %19 = tpu.dynamic_rotate %1 by %c112_i32_5 dim 1 : vector<1x128xf32>, i32 -> vector<1x128xf32>
    %20 = arith.select %18, %10, %19 : vector<1x128xi1>, vector<1x128xf32>
    %21 = arith.addf %12, %16 : vector<1x128xf32>
    %22 = arith.addf %21, %20 : vector<1x128xf32>
    %cst = arith.constant 2.000000e-01 : f32
    %23 = vector.broadcast %cst : f32 to vector<1x128xf32>
    %24 = arith.mulf %22, %23 : vector<1x128xf32>
    %c0_6 = arith.constant 0 : index
    %c0_7 = arith.constant 0 : index
    %c0_8 = arith.constant 0 : index
    %c0_9 = arith.constant 0 : index
    %25 = vector.load %arg2[%c0_6, %c0_7, %c0_8, %c0_9] : memref<3x1x1x128xf32, #tpu.memory_space<vmem>>, vector<1x1x1x128xf32>
    %26 = vector.shape_cast %25 : vector<1x1x1x128xf32> to vector<1x128xf32>
    %27 = vector.shape_cast %1 : vector<1x128xf32> to vector<1x1x1x128xf32>
    tpu.vector_store %arg2[%c0_6, %c0_7, %c0_8, %c0_9], %27 {strides = array<i32>} : memref<3x1x1x128xf32, #tpu.memory_space<vmem>>, vector<1x1x1x128xf32>,
    %28 = arith.subf %24, %1 : vector<1x128xf32>
    %cst_10 = arith.constant 0.00999999977 : f32
    %29 = vector.broadcast %cst_10 : f32 to vector<1x128xf32>
    %30 = arith.mulf %29, %28 : vector<1x128xf32>
    %31 = arith.addf %1, %30 : vector<1x128xf32>
    %c1 = arith.constant 1 : index
    %c0_11 = arith.constant 0 : index
    %c0_12 = arith.constant 0 : index
    %c0_13 = arith.constant 0 : index
    %32 = vector.load %arg2[%c1, %c0_11, %c0_12, %c0_13] : memref<3x1x1x128xf32, #tpu.memory_space<vmem>>, vector<1x1x1x128xf32>
    %33 = vector.shape_cast %32 : vector<1x1x1x128xf32> to vector<1x128xf32>
    %34 = vector.shape_cast %31 : vector<1x128xf32> to vector<1x1x1x128xf32>
    tpu.vector_store %arg2[%c1, %c0_11, %c0_12, %c0_13], %34 {strides = array<i32>} : memref<3x1x1x128xf32, #tpu.memory_space<vmem>>, vector<1x1x1x128xf32>,
    %cst_14 = arith.constant 5.000000e-01 : f32
    %35 = vector.broadcast %cst_14 : f32 to vector<1x128xf32>
    %36 = arith.mulf %35, %24 : vector<1x128xf32>
    %37 = arith.subf %1, %36 : vector<1x128xf32>
    %c2 = arith.constant 2 : index
    %c0_15 = arith.constant 0 : index
    %c0_16 = arith.constant 0 : index
    %c0_17 = arith.constant 0 : index
    %38 = vector.load %arg2[%c2, %c0_15, %c0_16, %c0_17] : memref<3x1x1x128xf32, #tpu.memory_space<vmem>>, vector<1x1x1x128xf32>
    %39 = vector.shape_cast %38 : vector<1x1x1x128xf32> to vector<1x128xf32>
    %40 = vector.shape_cast %37 : vector<1x128xf32> to vector<1x1x1x128xf32>
    tpu.vector_store %arg2[%c2, %c0_15, %c0_16, %c0_17], %40 {strides = array<i32>} : memref<3x1x1x128xf32, #tpu.memory_space<vmem>>, vector<1x1x1x128xf32>,
    return
  }
  func.func @transform_0(%arg0: i32) -> (i32, i32, i32) {
    %c0_i32 = arith.constant 0 : i32
    %c0_i32_0 = arith.constant 0 : i32
    %c0_i32_1 = arith.constant 0 : i32
    return %arg0, %c0_i32, %c0_i32_0 : i32, i32, i32
  }
  func.func @transform_1(%arg0: i32) -> (i32, i32, i32, i32) {
    %c0_i32 = arith.constant 0 : i32
    %c0_i32_0 = arith.constant 0 : i32
    %c0_i32_1 = arith.constant 0 : i32
    %c0_i32_2 = arith.constant 0 : i32
    return %c0_i32, %arg0, %c0_i32_0, %c0_i32_1 : i32, i32, i32, i32
  }
}

</mosaic_0001>

<bundles_post_ra>
// kernel: tpu_custom_call.1
= control target key start
LH: loop header
LB: loop body
LE: loop exit
PB: predicated region body
PF: predicated region fallthrough
CT: control target
= control target key end

     0   :  { %6 = vsyncpa [#allocation3], 0  ;;  %s597_s0 = inlined_call_operand.hbm [shape: f32[2,1,128], index: 0, kind: input, shape index: {}]   ;;  %s598_s1 = inlined_call_operand.hbm [shape: f32[3,2,1,128], index: 1, kind: output, shape index: {}]  }
   0x1   :  { %8 = vsyncpa [#allocation3 + $0x1], 0 }
   0x2   :  { %9 = vsyncpa [#allocation4], 0 }
   0x3   :  { %11 = vsyncpa [#allocation4 + $0x1], 0  ;;  %s425_s6 = smov 0   ;;  %s427_s7 = smov 0  }
   0x4   :  { %s429_s8 = smov 0   ;;  %s431_s9 = smov 0  }
   0x5 LB: > { %s446_s10 = sadd.s32 4294967295, %s405_s9   ;;  %s246_s11 = sadd.s32 4294967294, %s405_s9   ;;  %s405_s9 = sphi %s431_s9, %s613_s9   ;;  %s401_s8 = sphi %s429_s8, %s612_s8   ;;  %s397_s7 = sphi %s427_s7, %s611_s7   ;;  %s393_s6 = sphi %s425_s6, %s610_s6  }
   0x6   : > { %s450_s12 = sadd.s32 1, %s405_s9   ;;  %s24_s13 = sadd.s32 1, %s401_s8 }
   0x7   : > { %s21_s14 = ssub.s32 %s405_s9, %s450_s12  ;;  %p31_p0 = scmp.ne.s32.totalorder %s401_s8, %s397_s7 }
   0x8   : > { %p22_p1 = scmp.eq.s32.totalorder %s21_s14, 0  ;;  %p32_p2 = scmp.eq.s32.totalorder %s405_s9, 0 }
   0x9   : > { %p37_p3 = scmp.ne.s32.totalorder %s397_s7, %s393_s6  ;;  %p38_p4 = scmp.eq.s32.totalorder %s446_s10, 0 }
   0xa   : > { %s462_s15 = scalar_select %p22_p1, %s401_s8, %s24_s13  }
   0xb   : > { %p464_p5 = por %p32_p2, %p31_p0  ;;  %p468_p6 = por %p38_p4, %p37_p3 }
   0xc   : > { %p61_p7 = scmp.eq.s32.totalorder %s446_s10, 1  ;;  %p67_p8 = scmp.eq.s32.totalorder %s246_s11, 1 }
   0xd   : > { %p269_p10 = scmp.lt.s32.totalorder %s405_s9, 2  ;;  %s87_s20 = sand.u32 1, %s401_s8  }
   0xe   : > { %p475_p11 = por %p61_p7, %p31_p0  ;;  %p479_p12 = por %p67_p8, %p37_p3 }
   0xf   : > { %s249_s21 = sshll.u32 %s405_s9, 4  ;;  %s90_s25 = scalar_lea.vmem [#allocation2], %s87_s20 }
  0x10   : > { %s602_s18 = scalar_select %p475_p11, 1, 0 }
  0x11   : > { %s603_s19 = scalar_select %p479_p12, 1, 0 }
  0x12   : > { %s488_s24 = scalar_lea.hbm %s597_s0, %s249_s21  ;;  %s97_s26 = sshll.u32 %s90_s25, 4  ;;  %s490_s26 = int_to_ptr.vmem [resolvable:$true] %s97_s26 }
  0x13   : > { %p494_p13 = pnand %p269_p10, %p464_p5  ;;  %s88_s28 = scalar_lea.sflag [#allocation3], %s87_s20 }
  0x14   : > { %s309_s29 = scalar_lea.hbm %s488_s24, 16  ;;  %s314_s3 = scalar_lea.hbm %s597_s0, 32 }
  0x15   : > { %p310_p2 = scmp.ne.s32.totalorder %s488_s24, %s309_s29  ;;  %p311_p3 = pneg %p494_p13 }
  0x16   : > { %p315_p5 = scmp.lt.u32.totalorder %s488_s24, %s597_s0  ;;  %p316_p8 = scmp.lt.u32.totalorder %s314_s3, %s309_s29 }
  0x17   : > { %p312_p4 = pnand %p311_p3, %p310_p2  ;;  %p318_p9 = scmp.lt.u32.totalorder %s309_s29, %s488_s24 }
  0x18   : > { %p317_p10 = por %p316_p8, %p315_p5 }
  0x19   : > { %p313_p7 = pneg %p312_p4 }
  0x1a   : > { %p319_p0 = por %p318_p9, %p317_p10 }
  0x1c   : > { %p320_p1 = pnand %p319_p0, %p313_p7 }
  0x1e   : > { %323 = shalt.err (!%p320_p1)
}
  0x1f   : > { %s324_s11 = scalar_lea.vmem %s490_s26, 16  ;;  %s407_s13 = smov [#allocation2]  }
  0x20   : > { %p325_p2 = scmp.ne.s32.totalorder %s490_s26, %s324_s11  ;;  %s329_s14 = sshll.u32 %s407_s13, 4  ;;  %s330_s14 = int_to_ptr.vmem [resolvable:$false] %s329_s14 }
  0x21   : > { %s331_s16 = scalar_lea.vmem %s330_s14, 32  ;;  %p332_p11 = scmp.lt.s32.totalorder %s490_s26, %s330_s14 }
  0x22   : > { %p327_p4 = pnand %p325_p2, %p311_p3  ;;  %p333_p5 = scmp.lt.s32.totalorder %s331_s16, %s324_s11 }
  0x24   : > { %p328_p12 = pneg %p327_p4  ;;  %p334_p8 = por %p333_p5, %p332_p11 }
  0x26   : > { %p335_p9 = pnand %p334_p8, %p328_p12 }
  0x28   : > { %338 = shalt.err (!%p335_p9)
}
  0x29   : > { %264 = dma.hbm_to_vmem [thread:$0]  (!%p494_p13), %s488_s24, 16, %s490_s26, %s88_s28  }
  0x2a   : > { %p605_p0 = scmp.lt.s32.totalorder %s405_s9, 3  ;;  %p606_p1 = scmp.ge.s32.totalorder %s405_s9, 1 }
  0x2c   : > { %p103_p3 = pnand %p606_p1, %p605_p0 }
  0x2d   : > { %s530_s20 = sand.u32 (!%p103_p3), 1, %s397_s7  }
  0x2e   : > { %106 = sbr.rel (%p103_p3) target bundleno = 204 (0xcc), region = 24  ;;  %s109_s21 = scalar_lea.sflag (!%p103_p3), [#allocation3], %s530_s20 }
  0x2f   : > { %s111_s22 = scalar_lea.vmem (!%p103_p3), [#allocation2], %s530_s20 }
  0x35   : > { %384 = dma.done.wait (%p468_p6), %s109_s21, 16  }
  0x36   : > { %386 = vsyncadd (%p468_p6), %s109_s21, 4294967280  ;;  %s256_s23 = smul.u32 3, %s530_s20  ;;  %v129_v0 = vld [vmem:[%s111_s22] sm:$0x1]  ;;  %s408_s25 = smov 8   ;;  %v130_v1 = vlaneseq }
  0x37   : > { %133 = vrot.lane.b32.xlu0 %v129_v0, %s408_s25  ;;  %s409_s26 = smov 16   ;;  %s410_s27 = smov 120  }
  0x38   : > { %s539_s24 = scalar_lea.vmem [#allocation5], %s256_s23  ;;  %143 = vrot.lane.b32.xlu1 %v129_v0, %s409_s26  ;;  %s411_s28 = smov 112   ;;  %v131_v2 = vand.u32 127, %v130_v1 }
  0x39   : > { %153 = vst [vmem:[%s539_s24] sm:$0x1] %v129_v0  ;;  %s176_s17 = sshll.u32 %s539_s24, 4  ;;  %s253_s29 = sshll.u32 %s446_s10, 4  ;;  %s545_s17 = int_to_ptr.vmem [resolvable:$true] %s176_s17 }
  0x3a   : > { %vm132_vm0 = vcmp.lt.s32.totalorder %v131_v2, 8  ;;  %vm136_vm1 = vcmp.ge.s32.totalorder %v131_v2, 120  ;;  %vm142_vm2 = vcmp.lt.s32.totalorder %v131_v2, 16  ;;  %vm146_vm3 = vcmp.ge.s32.totalorder %v131_v2, 112  ;;  %s550_s3 = scalar_lea.hbm %s598_s1, %s253_s29  ;;  %s164_s4 = scalar_lea.sflag [#allocation4], %s530_s20 }
  0x3b   : > { %137 = vrot.lane.b32.xlu0 %v129_v0, %s410_s27  ;;  %s339_s5 = scalar_lea.vmem %s545_s17, 48  ;;  %p607_p11 = scmp.ne.s32.totalorder %s602_s18, 0 }
  0x3c   : > { %147 = vrot.lane.b32.xlu1 %v129_v0, %s411_s28  ;;  %p340_p6 = scmp.ne.s32.totalorder %s545_s17, %s339_s5  ;;  %s412_s10 = smov [#allocation5]  }
  0x3d   : > { %s343_s11 = sshll.u32 %s412_s10, 4  ;;  %s344_s11 = int_to_ptr.vmem [resolvable:$false] %s343_s11 }
  0x3e   : > { %p341_p12 = pnand %p340_p6, %p607_p11  ;;  %s345_s13 = scalar_lea.vmem %s344_s11, 96 }
  0x3f   : > { %p346_p7 = scmp.lt.s32.totalorder %s545_s17, %s344_s11  ;;  %p347_p10 = scmp.lt.s32.totalorder %s345_s13, %s339_s5 }
  0x40   : > { %p342_p13 = pneg %p341_p12 }
  0x41   : > { %p348_p2 = por %p347_p10, %p346_p7 }
  0x43   : > { %p349_p4 = pnand %p348_p2, %p342_p13 }
  0xa9   : > { %v134_v3 = vpop.permute.xlu0 %133 }
  0xaa   : > { %v144_v4 = vpop.permute.xlu1 %143  ;;  %v135_v5 = vsel %vm132_vm0, %v129_v0, %v134_v3 }
  0xab   : > { %v140_v6 = vadd.f32 %v135_v5, %v129_v0  ;;  %v145_v11 = vsel %vm142_vm2, %v135_v5, %v144_v4 }
  0xad   : > { %v138_v7 = vpop.permute.xlu0 %137 }
  0xae   : > { %v139_v8 = vsel %vm136_vm1, %v129_v0, %v138_v7  ;;  %v148_v10 = vpop.permute.xlu1 %147 }
  0xaf   : > { %v141_v9 = vadd.f32 %v140_v6, %v139_v8  ;;  %v149_v13 = vsel %vm146_vm3, %v139_v8, %v148_v10 }
  0xb1   : > { %v150_v12 = vadd.f32 %v145_v11, %v141_v9 }
  0xb3   : > { %v151_v14 = vadd.f32 %v150_v12, %v149_v13 }
  0xb5   : > { %v152_v15 = vmul.f32 0.2, %v151_v14 }
  0xb7   : > { %v154_v16 = vsub.f32 %v152_v15, %v129_v0  ;;  %v159_v17 = vmul.f32 0.5, %v152_v15 }
  0xb9   : > { %v155_v18 = vmul.f32 0.01, %v154_v16  ;;  %v160_v19 = vsub.f32 %v129_v0, %v159_v17 }
  0xbb   : > { %v156_v20 = vadd.f32 %v155_v18, %v129_v0  ;;  %252 = vst [vmem:[%s539_s24 + $0x2] sm:$0x1] %v160_v19 }
  0xbd   : > { %251 = vst [vmem:[%s539_s24 + $0x1] sm:$0x1] %v156_v20 }
  0xbe   : > { %352 = shalt.err (!%p349_p4)
}
  0xbf   : > { %s353_s14 = scalar_lea.hbm %s550_s3, 48  ;;  %s357_s22 = scalar_lea.hbm %s598_s1, 96 }
  0xc0   : > { %p354_p5 = scmp.ne.s32.totalorder %s550_s3, %s353_s14  ;;  %p358_p0 = scmp.lt.u32.totalorder %s550_s3, %s598_s1 }
  0xc1   : > { %p359_p1 = scmp.lt.u32.totalorder %s357_s22, %s353_s14  ;;  %p361_p6 = scmp.lt.u32.totalorder %s353_s14, %s550_s3 }
  0xc2   : > { %p355_p8 = pnand %p354_p5, %p607_p11 }
  0xc3   : > { %p360_p3 = por %p359_p1, %p358_p0 }
  0xc4   : > { %p356_p9 = pneg %p355_p8 }
  0xc5   : > { %p362_p12 = por %p361_p6, %p360_p3 }
  0xc7   : > { %p363_p13 = pnand %p362_p12, %p356_p9 }
  0xc9   : > { %366 = shalt.err (!%p363_p13)
}
  0xca   : > { %s413_s25 = smov 32   ;;  %s414_s27 = smov 1  }
  0xcb   : > { %259 = dma.vmem_to_hbm [thread:$0]  (%p607_p11), %s545_s17, 48, %s550_s3, %s164_s4, %s409_s26, %s413_s25, %s414_s27  }
  0xcc PF: > { %s191_s28 = sand.u32 1, %s393_s6   ;;  %p608_p7 = scmp.ne.s32.totalorder %s603_s19, 0 }
  0xcd   : > { %p609_p10 = scmp.ge.s32.totalorder %s405_s9, 2  ;;  %s192_s29 = scalar_lea.sflag [#allocation4], %s191_s28 }
  0xcf   : > { %p266_p2 = pnand %p609_p10, %p608_p7 }
  0xd1   : > { %388 = dma.done.wait (!%p266_p2), %s192_s29, 48  }
  0xd2   : > { %390 = vsyncadd (!%p266_p2), %s192_s29, 4294967248  ;;  %p14_p4 = scmp.ge.s32.totalorder %s450_s12, 4   ;;  %s610_s6 = smov %s397_s7 }
  0xd3   : > { %s611_s7 = smov %s401_s8  ;;  %s612_s8 = smov %s462_s15 }
  0xd4   : > { %s613_s9 = smov %s450_s12  ;;  %16 = sbr.rel (!%p14_p4) target bundleno = 5 (0x5), region = 71 }
  0xdb   :  { %197 = vsyncpa [#allocation3], 1 }
  0xdc   :  { %199 = vsyncpa [#allocation3 + $0x1], 1 }
  0xdd   :  { %200 = vsyncpa [#allocation4], 1 }
  0xde   :  { %202 = vsyncpa [#allocation4 + $0x1], 1 }

</bundles_post_ra>
